<compile_context>
chip_gen: v6e
topology: v6e:2x2x1
jax: 0.10.0
libtpu: 0.0.40
codegen_flags: <defaults>
</compile_context>

<pallas_src>
import functools

import jax
import jax.numpy as jnp
from jax.experimental import pallas as pl
from jax.experimental.pallas import tpu as pltpu


def _round_up(a: int, m: int) -> int:
    return ((a + m - 1) // m) * m


def _default_tn() -> int:
    """N-tile width for the (rare) weight-too-big-for-VMEM path.

    v5e's MXU is 4x(128x128) -> 128-wide N tiles; v6e/v7x (256-wide MXU) -> 256.
    Best-effort hardware query; falls back to 256 on any failure.
    """
    try:
        info = pltpu.get_tpu_info()
        name = str(getattr(info, "chip_version", "")).lower()
        if "5" in name:
            return 128
    except Exception:
        pass
    return 256


def _td_linear_kernel(x_ref, w_ref, b_ref, o_ref, *, compute_dtype):
    # One tile: (tm, F) @ (F, tn) on the MXU with f32 accumulation, f32 bias
    # add in the epilogue, cast on store.  Optional operand downcast happens
    # here (in VMEM/vregs) so the wrapper never materializes a cast copy in HBM.
    x = x_ref[...]
    w = w_ref[...]
    if compute_dtype is not None:
        x = x.astype(compute_dtype)
        w = w.astype(compute_dtype)
    acc = jnp.dot(x, w, preferred_element_type=jnp.float32)
    o_ref[...] = (acc + b_ref[...].astype(jnp.float32)).astype(o_ref.dtype)


def _linear_pallas(x2d, w, b, *, tm=512, tn=None, compute_dtype=None,
                   force_pallas=False):
    """x2d: (M, F), w: (F, O), b: (1, O) or (O,) -> (M, O)."""
    M, F = x2d.shape
    O = w.shape[1]
    b2 = b.reshape(1, O)
    out_dtype = x2d.dtype
    itemsize = jnp.dtype(out_dtype).itemsize

    # ---- tiny-problem fallback (biggest win at ADAVANNE production shapes) --
    # Launch + grid-step + pad/slice overhead of any custom kernel dominates
    # here; XLA fuses the whole thing into one pass.
    if not force_pallas and (M * F * O < (1 << 20) or M * O <= (1 << 16)):
        return (x2d @ w + b2).astype(out_dtype)

    # ---- output-column handling --------------------------------------------
    # Only go lane-dense (pad O to a multiple of 128) when O is large enough
    # that the padding waste is marginal; for small O a full-last-dim block
    # with masked stores is far cheaper than an 8x padded HBM writeback.
    O_pad128 = _round_up(O, 128)
    pad_O = (O % 128 == 0) or (O >= 96 and (O_pad128 - O) * 4 <= O)
    # Keep the whole weight resident in VMEM (1-D grid) unless it is big.
    split_n = F * O_pad128 * itemsize > (4 << 20)
    if split_n:
        pad_O = True
    O_eff = O_pad128 if pad_O else O

    w_p = w if O_eff == O else jnp.pad(w, ((0, 0), (0, O_eff - O)))
    b_p = b2 if O_eff == O else jnp.pad(b2, ((0, 0), (0, O_eff - O)))

    # ---- row tile (no M padding; Pallas masks the ragged last block) --------
    sub = 16 if compute_dtype == jnp.bfloat16 else 8
    tm_eff = max(sub, min(_round_up(tm, sub), _round_up(M, sub)))
    grid_m = pl.cdiv(M, tm_eff)

    kernel = functools.partial(_td_linear_kernel, compute_dtype=compute_dtype)

    if not split_n:
        # 1-D grid over row tiles; weight + bias resident (fetched once).
        tn_eff = O_eff
        grid = (grid_m,)
        in_specs = [
            pl.BlockSpec((tm_eff, F), lambda i: (i, 0)),
            pl.BlockSpec((F, O_eff), lambda i: (0, 0)),   # constant -> no re-DMA
            pl.BlockSpec((1, O_eff), lambda i: (0, 0)),   # constant -> no re-DMA
        ]
        out_specs = pl.BlockSpec((tm_eff, O_eff), lambda i: (i, 0))
        dims = ("parallel",)
        w_fetches = 1
    else:
        # Large weight: lane-dense 2-D (M, N) grid.
        tn_req = tn if tn is not None else _default_tn()
        tn_eff = max(128, min(_round_up(tn_req, 128), O_eff))
        if O_eff % tn_eff != 0:
            tn_eff = 128
        grid = (grid_m, O_eff // tn_eff)
        in_specs = [
            pl.BlockSpec((tm_eff, F), lambda i, j: (i, 0)),
            pl.BlockSpec((F, tn_eff), lambda i, j: (0, j)),
            pl.BlockSpec((1, tn_eff), lambda i, j: (0, j)),
        ]
        out_specs = pl.BlockSpec((tm_eff, tn_eff), lambda i, j: (i, j))
        dims = ("parallel", "parallel")
        w_fetches = grid_m
    # TODO(synk): add a third ("arbitrary") K grid axis + f32 VMEM accumulator
    # if F ever becomes large enough that the (F, tn) weight tile hurts VMEM.

    # ---- scheduling hints ----------------------------------------------------
    cost = pl.CostEstimate(
        flops=2 * M * F * O_eff,
        transcendentals=0,
        bytes_accessed=int(
            M * F * itemsize                       # x streamed once
            + w_fetches * F * O_eff * itemsize     # weight (once if resident)
            + O_eff * itemsize                     # bias
            + M * O_eff * itemsize                 # output writeback
        ),
    )
    # Double-buffered tiles (x, w, b, out); floor 8 MiB, cap 48 MiB so we never
    # claim the whole 64 MiB of a v7x TensorCore.
    tile_bytes = 2 * (tm_eff * F + F * tn_eff + tn_eff + tm_eff * tn_eff) * itemsize
    vmem_limit = int(min(max(4 * tile_bytes, 8 << 20), 48 << 20))

    y = pl.pallas_call(
        kernel,
        out_shape=jax.ShapeDtypeStruct((M, O_eff), out_dtype),
        grid_spec=pltpu.PrefetchScalarGridSpec(
            num_scalar_prefetch=0,
            grid=grid,
            in_specs=in_specs,
            out_specs=out_specs,
        ),
        compiler_params=pltpu.CompilerParams(
            dimension_semantics=dims,
            vmem_limit_bytes=vmem_limit,
        ),
        cost_estimate=cost,
    )(x2d, w_p, b_p)

    return y if O_eff == O else y[:, :O]


def time_distributed_linear(x, w, b, *, batch_first=False, compute_dtype=None,
                            tm=512, tn=None, force_pallas=False):
    """Reproduces TimeDistributed(nn.Linear(F, O)).forward(x).

    x: rank <= 2  -> apply linear directly.
       rank >= 3  -> flatten to (-1, F), apply linear, reshape:
                     batch_first=False: (-1, x.shape[1], O)
                     batch_first=True:  (x.shape[0], -1, O)
    """
    O = w.shape[1]
    kw = dict(tm=tm, tn=tn, compute_dtype=compute_dtype, force_pallas=force_pallas)
    if x.ndim <= 2:
        x2d = x if x.ndim == 2 else x[None, :]
        y = _linear_pallas(x2d, w, b, **kw)
        return y if x.ndim == 2 else y[0]

    F = x.shape[-1]
    y = _linear_pallas(x.reshape(-1, F), w, b, **kw)
    if batch_first:
        return y.reshape(x.shape[0], -1, O)
    return y.reshape(-1, x.shape[1], O)


def _reference(x, w, b, *, batch_first=False):
    O = w.shape[1]
    bb = b.reshape(1, -1)
    if x.ndim <= 2:
        return x @ w + (bb if x.ndim == 2 else bb[0])
    y = x.reshape(-1, x.shape[-1]) @ w + bb
    if batch_first:
        return y.reshape(x.shape[0], -1, O)
    return y.reshape(-1, x.shape[1], O)


if __name__ == "__main__":
    key = jax.random.PRNGKey(0)
    k_x, k_w, k_b = jax.random.split(key, 3)

    # Shapes consistent with the ADAVANNE_sed usage: (seq, batch, features).
    T, B, F, O = 8, 2, 32, 16
    x = jax.random.normal(k_x, (T, B, F), dtype=jnp.float32)
    w = jax.random.normal(k_w, (F, O), dtype=jnp.float32) * 0.1   # weight.T
    b = jax.random.normal(k_b, (1, O), dtype=jnp.float32) * 0.1
    y_ref = _reference(x, w, b)

    # 1) Production-size call: tiny problem -> XLA fallback (overhead-free path).
    y = jax.block_until_ready(time_distributed_linear(x, w, b))
    assert y.shape == (T, B, O), y.shape
    assert jnp.allclose(y, y_ref, atol=1e-5, rtol=1e-5)

    # 2) Same shapes forced through the Pallas kernel (small-O unpadded output,
    #    resident weight, single row tile).
    y_k = jax.block_until_ready(time_distributed_linear(x, w, b, force_pallas=True))
    assert jnp.allclose(y_k, y_ref, atol=1e-5, rtol=1e-5)

    # batch_first=True branch.
    y_bf = jax.block_until_ready(
        time_distributed_linear(x, w, b, batch_first=True, force_pallas=True))
    assert jnp.allclose(y_bf, _reference(x, w, b, batch_first=True),
                        atol=1e-5, rtol=1e-5)

    # rank-2 / rank-1 fast paths (tiny -> XLA fallback).
    y2 = jax.block_until_ready(time_distributed_linear(x[:, 0, :], w, b))
    assert jnp.allclose(y2, _reference(x[:, 0, :], w, b), atol=1e-5, rtol=1e-5)
    y1 = jax.block_until_ready(time_distributed_linear(x[0, 0, :], w, b))
    assert jnp.allclose(y1, _reference(x[0, 0, :], w, b), atol=1e-5, rtol=1e-5)

    # Ragged shapes through the kernel: M=21 rows (masked partial row tile),
    # O=48 (small-O, unpadded masked-store output).
    T2, B2, F2, O2 = 7, 3, 40, 48
    x2 = jax.random.normal(k_x, (T2, B2, F2), dtype=jnp.float32)
    w2 = jax.random.normal(k_w, (F2, O2), dtype=jnp.float32) * 0.1
    b2 = jax.random.normal(k_b, (1, O2), dtype=jnp.float32) * 0.1
    yr = jax.block_until_ready(time_distributed_linear(x2, w2, b2, force_pallas=True))
    assert yr.shape == (T2, B2, O2), yr.shape
    assert jnp.allclose(yr, _reference(x2, w2, b2), atol=1e-5, rtol=1e-5)

    # Larger shape that naturally takes the Pallas path: 1-D grid over 512-row
    # tiles, lane-dense O=128, weight resident in VMEM.
    T3, B3, F3, O3 = 128, 16, 64, 128
    x3 = jax.random.normal(k_x, (T3, B3, F3), dtype=jnp.float32)
    w3 = jax.random.normal(k_w, (F3, O3), dtype=jnp.float32) * 0.1
    b3 = jax.random.normal(k_b, (1, O3), dtype=jnp.float32) * 0.1
    y3 = jax.block_until_ready(time_distributed_linear(x3, w3, b3))
    assert y3.shape == (T3, B3, O3), y3.shape
    assert jnp.allclose(y3, _reference(x3, w3, b3), atol=1e-3, rtol=1e-3)

    # bf16 MXU operands (valid on v5e/v6e/v7x); cast happens in-kernel,
    # accumulation + bias epilogue stay f32.
    yb = jax.block_until_ready(
        time_distributed_linear(x, w, b, compute_dtype=jnp.bfloat16,
                                force_pallas=True))
    assert jnp.allclose(yb, y_ref, atol=1e-1, rtol=1e-1)

    print("KERNEL_OK")
</pallas_src>

<mosaic_0001>
module attributes {stable_mosaic.version = 11 : i64} {
  func.func @_td_linear_kernel(%arg0: i32, %arg1: memref<16x32xf32, #tpu.memory_space<vmem>>, %arg2: memref<32x16xf32, #tpu.memory_space<vmem>>, %arg3: memref<1x16xf32, #tpu.memory_space<vmem>>, %arg4: memref<16x16xf32, #tpu.memory_space<vmem>>) attributes {dimension_semantics = [#tpu.dimension_semantics<parallel>], iteration_bounds = array<i64: 1>, scalar_prefetch = 0 : i64, scratch_operands = 0 : i64, tpu.core_type = #tpu.core_type<tc>, window_params = [{transform_indices = @transform_0, window_bounds = array<i64: 16, 32>}, {pipeline_mode = #tpu.pipeline_mode<synchronous>, transform_indices = @transform_1, window_bounds = array<i64: 32, 16>}, {pipeline_mode = #tpu.pipeline_mode<synchronous>, transform_indices = @transform_2, window_bounds = array<i64: 1, 16>}, {transform_indices = @transform_3, window_bounds = array<i64: 16, 16>}]} {
    %c0 = arith.constant 0 : index
    %c0_0 = arith.constant 0 : index
    %0 = vector.load %arg1[%c0, %c0_0] : memref<16x32xf32, #tpu.memory_space<vmem>>, vector<16x32xf32>
    %c0_1 = arith.constant 0 : index
    %c0_2 = arith.constant 0 : index
    %1 = vector.load %arg2[%c0_1, %c0_2] : memref<32x16xf32, #tpu.memory_space<vmem>>, vector<32x16xf32>
    %cst = arith.constant dense<0.000000e+00> : vector<16x16xf32>
    %2 = tpu.matmul %0, %1, %cst {dimension_numbers = #tpu.dot_dimension_numbers<[1], [0], [0], [1], [0, 0, 1, 1], [], []>} : vector<16x32xf32>, vector<32x16xf32>, vector<16x16xf32> -> vector<16x16xf32>
    %c0_3 = arith.constant 0 : index
    %c0_4 = arith.constant 0 : index
    %3 = vector.load %arg3[%c0_3, %c0_4] : memref<1x16xf32, #tpu.memory_space<vmem>>, vector<1x16xf32>
    %4 = vector.broadcast %3 : vector<1x16xf32> to vector<16x16xf32>
    %5 = arith.addf %2, %4 : vector<16x16xf32>
    %c0_5 = arith.constant 0 : index
    %c0_6 = arith.constant 0 : index
    %6 = vector.load %arg4[%c0_5, %c0_6] : memref<16x16xf32, #tpu.memory_space<vmem>>, vector<16x16xf32>
    tpu.vector_store %arg4[%c0_5, %c0_6], %5 {strides = array<i32>} : memref<16x16xf32, #tpu.memory_space<vmem>>, vector<16x16xf32>,
    return
  }
  func.func @transform_0(%arg0: i32) -> (i32, i32) {
    %c0_i32 = arith.constant 0 : i32
    %c0_i32_0 = arith.constant 0 : i32
    return %arg0, %c0_i32 : i32, i32
  }
  func.func @transform_1(%arg0: i32) -> (i32, i32) {
    %c0_i32 = arith.constant 0 : i32
    %c0_i32_0 = arith.constant 0 : i32
    %c0_i32_1 = arith.constant 0 : i32
    return %c0_i32, %c0_i32_0 : i32, i32
  }
  func.func @transform_2(%arg0: i32) -> (i32, i32) {
    %c0_i32 = arith.constant 0 : i32
    %c0_i32_0 = arith.constant 0 : i32
    %c0_i32_1 = arith.constant 0 : i32
    return %c0_i32, %c0_i32_0 : i32, i32
  }
  func.func @transform_3(%arg0: i32) -> (i32, i32) {
    %c0_i32 = arith.constant 0 : i32
    %c0_i32_0 = arith.constant 0 : i32
    return %arg0, %c0_i32 : i32, i32
  }
}

</mosaic_0001>

<bundles_post_ra>
// kernel: tpu_custom_call.1
= control target key start
LH: loop header
LB: loop body
LE: loop exit
PB: predicated region body
PF: predicated region fallthrough
CT: control target
= control target key end

     0   :  { %vm28_vm0 = vcmask 261120   ;;  %s221_s0 = inlined_call_operand.vmem [shape: f32[16,32], index: 0, kind: input, shape index: {}]   ;;  %s222_s1 = inlined_call_operand.vmem [shape: f32[32,16], index: 1, kind: input, shape index: {}]   ;;  %s223_s2 = inlined_call_operand.vmem [shape: f32[1,16], index: 2, kind: input, shape index: {}]   ;;  %s224_s3 = inlined_call_operand.hbm [shape: f32[16,16], index: 3, kind: output, shape index: {}]  }
   0x1   :  { %v20_v0 = vld [vmem:[%s222_s1 + $0x18] sm:$0xff]  ;;  %v19_v1 = vld [vmem:[%s222_s1 + $0x10] sm:$0xff]  ;;  %v15_v2 = vld [vmem:[%s221_s0] sm:$0xff] }
   0x2   :  { %138 = vmatprep.subr.mxu0 %v20_v0  ;;  %v18_v3 = vld [vmem:[%s222_s1 + $0x8] sm:$0xff]  ;;  %146 = vmatprep.mubr.msk.f32.mxu0 %vm28_vm0, %v15_v2 }
   0x3   :  { %139 = vmatpush3.msra.mxu0 %v20_v0 }
   0x4   :  { %8 = vsyncpa [#allocation3], 0  ;;  %140 = vmatprep.subr.mxu0 %v19_v1  ;;  %v17_v4 = vld [vmem:[%s222_s1] sm:$0xff]  ;;  %v16_v5 = vld [vmem:[%s221_s0 + $0x8] sm:$0xff]  ;;  %s174_s26 = smov [#allocation2]   ;;  %vm110_vm1 = vcmask 130048  }
   0x5   :  { %141 = vmatpush3.msra.mxu0 %v19_v1  ;;  %v129_v6 = vld [vmem:[%s223_s2] ss:$0 sm:$0xff]  ;;  %s118_s27 = sshll.u32 %s174_s26, 4  ;;  %s119_s27 = int_to_ptr.vmem [resolvable:$true] %s118_s27 }
   0x6   :  { %142 = vmatprep.subr.mxu0 %v18_v3  ;;  %s152_s1 = scalar_lea.vmem %s119_s27, 256  ;;  %p157_p1 = scmp.lt.s32.totalorder %s119_s27, %s119_s27 }
   0x7   :  { %143 = vmatpush3.msra.mxu0 %v18_v3  ;;  %p153_p0 = scmp.ne.s32.totalorder %s119_s27, %s152_s1  ;;  %p158_p2 = scmp.lt.s32.totalorder %s152_s1, %s152_s1 }
   0x8   :  { %144 = vmatprep.subr.mxu0 %v17_v4 }
   0x9   :  { %145 = vmatpush3.msra.mxu0 %v17_v4  ;;  %p159_p3 = por %p158_p2, %p157_p1 }
   0xa   :  { %147 = vmatmul.mubr.msk.f32.vlgmr.msra.gmra.mxu0 %vm28_vm0, %v16_v5 }
   0xb   :  { %p160_p4 = pnand %p159_p3, %p153_p0 }
  0xca   :  { %v148_v7 = vpop.f32.mrf.mxu0 }
  0xcb   :  { %v107_v8 = vadd.f32 %v148_v7, %v129_v6 }
  0xcc   :  { %v101_v9 = vpop.f32.mrf.mxu0 }
  0xcd   :  { %112 = vst.msk [vmem:[#allocation2 + $0x8] sm:$0xff] %vm110_vm1, %v107_v8  ;;  %v102_v10 = vadd.f32 %v129_v6, %v101_v9 }
  0xcf   :  { %111 = vst.msk [vmem:[#allocation2] sm:$0xff] %vm110_vm1, %v102_v10 }
  0xd0   :  { %163 = shalt.err (!%p160_p4)
}
  0xd1   :  { %s175_s0 = smov 128   ;;  %s176_s28 = smov 8  }
  0xd2   :  { %124 = dma.vmem_to_hbm [thread:$0]  %s119_s27, 256, %s224_s3, [#allocation3], %s175_s0, %s175_s0, %s176_s28  }
  0xd3   :  { %172 = dma.done.wait [#allocation3], 256  }
  0xd4   :  { %173 = vsyncadd [#allocation3], 4294967040 }
  0xd5   :  { %128 = vsyncpa [#allocation3], 1 }

</bundles_post_ra>
